<compile_context>
chip_gen: v6e
topology: v6e:2x2x1
jax: 0.10.0
libtpu: 0.0.40
codegen_flags: <defaults>
</compile_context>

<pallas_src>
import functools

import jax
import jax.numpy as jnp
from jax import lax
from jax.experimental import pallas as pl
from jax.experimental.pallas import tpu as pltpu

_NEG_BIG = -1e30  # finite "-inf": avoids -inf - (-inf) = NaN in the online LSE


def _mask_diagonal(s):
    row_l = lax.broadcasted_iota(jnp.int32, s.shape, 0)
    col_l = lax.broadcasted_iota(jnp.int32, s.shape, 1)
    return jnp.where(row_l == col_l, _NEG_BIG, s)


def _ntxent_kernel_partner(xr_ref, xc_ref, xp_ref, out_ref,
                           xr_scr, m_ref, l_ref, *,
                           grid_cols, inv_tau, mm_dtype):
    """Fast path: batch_size % tile == 0, positives come from a partner block."""
    i = pl.program_id(0)          # row block (parallel)
    j = pl.program_id(1)          # column block (reduction axis, arbitrary)

    @pl.when(j == 0)
    def _init():
        # Row operand preprocessing (1/tau fold, matmul dtype) done once per
        # row block and cached; reused for all grid_cols column steps.
        xr_scr[...] = (xr_ref[...].astype(jnp.float32)
                       * jnp.float32(inv_tau)).astype(mm_dtype)
        m_ref[...] = jnp.full_like(m_ref, _NEG_BIG)
        l_ref[...] = jnp.zeros_like(l_ref)

    # (T, D) x (T, D) contracting D on both sides -> (T, T); no transpose.
    s = lax.dot_general(xr_scr[...], xc_ref[...],
                        dimension_numbers=(((1,), (1,)), ((), ())),
                        preferred_element_type=jnp.float32)

    # Self-similarity mask: only i == j tiles can intersect the diagonal, so
    # off-diagonal tiles skip the iota/compare/select entirely.
    if grid_cols == 1:
        s = _mask_diagonal(s)
    else:
        s = lax.cond(i == j, _mask_diagonal, lambda t: t, s)

    # Online logsumexp update over the column (reduction) axis.
    m_prev = m_ref[...]
    m_new = jnp.maximum(m_prev, jnp.max(s, axis=-1, keepdims=True))
    l_ref[...] = (jnp.exp(m_prev - m_new) * l_ref[...]
                  + jnp.sum(jnp.exp(s - m_new), axis=-1, keepdims=True))
    m_ref[...] = m_new

    @pl.when(j == grid_cols - 1)
    def _finalize():
        # Positive logit = <x_i, x_{(i+N)%2N}> / tau as a row-wise
        # multiply-reduce against the partner block: O(T*D) instead of the old
        # O(T^2) select + lane-sum on up to two column tiles.
        pos = jnp.sum(xr_scr[...].astype(jnp.float32)
                      * xp_ref[...].astype(jnp.float32),
                      axis=-1, keepdims=True)
        out_ref[...] = m_ref[...] + jnp.log(l_ref[...]) - pos


def _ntxent_kernel_generic(xr_ref, xc_ref, out_ref,
                           xr_scr, m_ref, l_ref, pos_ref, *,
                           tile, batch_size, two_n, grid_cols, inv_tau,
                           mm_dtype):
    """Fallback for batch_size % tile != 0 (iota-based positive extraction)."""
    i = pl.program_id(0)
    j = pl.program_id(1)

    @pl.when(j == 0)
    def _init():
        xr_scr[...] = (xr_ref[...].astype(jnp.float32)
                       * jnp.float32(inv_tau)).astype(mm_dtype)
        m_ref[...] = jnp.full_like(m_ref, _NEG_BIG)
        l_ref[...] = jnp.zeros_like(l_ref)
        pos_ref[...] = jnp.zeros_like(pos_ref)

    s = lax.dot_general(xr_scr[...], xc_ref[...],
                        dimension_numbers=(((1,), (1,)), ((), ())),
                        preferred_element_type=jnp.float32)

    if grid_cols == 1:
        s = _mask_diagonal(s)
    else:
        s = lax.cond(i == j, _mask_diagonal, lambda t: t, s)

    # Positive logit: extract only on the column tile(s) that can contain it.
    def _accumulate_positive():
        row_l = lax.broadcasted_iota(jnp.int32, s.shape, 0)
        col_l = lax.broadcasted_iota(jnp.int32, s.shape, 1)
        row_g = i * tile + row_l
        col_g = j * tile + col_l
        pos_col = jnp.where(row_g < batch_size, row_g + batch_size,
                            row_g - batch_size)      # == (row + N) % 2N
        pos_ref[...] += jnp.sum(jnp.where(col_g == pos_col, s, 0.0),
                                axis=-1, keepdims=True)

    if grid_cols == 1:
        _accumulate_positive()
    else:
        start = i * tile + batch_size
        start = jnp.where(start >= two_n, start - two_n, start)
        end = start + (tile - 1)
        end = jnp.where(end >= two_n, end - two_n, end)
        has_pos = jnp.logical_or(j == start // tile, j == end // tile)
        pl.when(has_pos)(_accumulate_positive)

    m_prev = m_ref[...]
    m_new = jnp.maximum(m_prev, jnp.max(s, axis=-1, keepdims=True))
    l_ref[...] = (jnp.exp(m_prev - m_new) * l_ref[...]
                  + jnp.sum(jnp.exp(s - m_new), axis=-1, keepdims=True))
    m_ref[...] = m_new

    @pl.when(j == grid_cols - 1)
    def _finalize():
        out_ref[...] = m_ref[...] + jnp.log(l_ref[...]) - pos_ref[...]


def _vmem_capacity_bytes():
    try:
        return int(pltpu.get_tpu_info().vmem_capacity_bytes)
    except Exception:
        return 64 * 1024 * 1024   # conservative (v7x-sized) default


def _pick_tile(two_n, batch_size, d, mm_dtype, vmem_cap):
    """Pick the row/column tile for the (2N, 2N) similarity grid."""
    itemsize = jnp.dtype(mm_dtype).itemsize
    min_sub = {1: 32, 2: 16}.get(itemsize, 8)   # sublane packing per dtype
    cands = [t for t in (512, 256, 128, 64, 32, 16, 8)
             if t <= two_n and two_n % t == 0 and t % min_sub == 0]
    if not cands:
        return two_n   # tiny / odd 2N: single full-extent block

    budget = vmem_cap // 2   # leave headroom for compiler-internal scratch

    def footprint(t):
        return (6 * t * d * itemsize        # row/col double-buffers + partner
                + t * d * 4                 # cached scaled row operand
                + 6 * t * t * 4)            # (T,T) f32 matmul/exp temporaries

    fitting = [t for t in cands if footprint(t) <= budget]
    pool = fitting if fitting else [min(cands)]

    def score(t):
        return (two_n // t >= 2,            # >= 2 row blocks: both v7x TCs
                batch_size % t == 0,        # partner-block positive path
                t)                          # larger tiles fill the 256x256 MXU
    return max(pool, key=score)


def joint_loss(representation, *, temperature=0.1, cosine_similarity=False,
               bf16_matmul=None, block_rows=None):
    """Pallas wrapper matching JointLoss.forward(representation)."""
    two_n, d = representation.shape
    batch_size = two_n // 2
    assert two_n == 2 * batch_size, "representation must have an even row count"

    if bf16_matmul is None:
        bf16_matmul = representation.dtype == jnp.bfloat16
    mm_dtype = jnp.bfloat16 if bf16_matmul else jnp.float32

    # One-time operand preparation (hoisted out of the kernel so it is not
    # repeated grid times per row/column stream).
    x = representation
    if cosine_similarity:
        # TODO(synk): torch.nn.CosineSimilarity clamps ||a||*||b|| at eps; we
        # clamp each row norm individually (differs only for near-zero rows).
        xf = x.astype(jnp.float32)
        norm2 = jnp.sum(xf * xf, axis=-1, keepdims=True)
        x = xf * lax.rsqrt(jnp.maximum(norm2, 1e-16))
    x = x.astype(mm_dtype)

    vmem_cap = _vmem_capacity_bytes()
    if block_rows is not None:
        tile = int(block_rows)
        assert two_n % tile == 0 and (tile % 8 == 0 or tile == two_n)
    else:
        tile = _pick_tile(two_n, batch_size, d, mm_dtype, vmem_cap)
    grid = two_n // tile
    use_partner = (batch_size % tile == 0) and grid >= 2

    itemsize = jnp.dtype(mm_dtype).itemsize
    vmem_est = (6 * tile * d * itemsize
                + tile * d * 4
                + 4 * tile * 4
                + 6 * tile * tile * 4)
    # Cap the scoped VMEM limit at 80% of physical VMEM (sized for 64 MiB v7x
    # as well as 128 MiB v5e/v6e) so internal scratch still has headroom.
    vmem_limit = int(min(int(0.8 * vmem_cap),
                         max(32 * 1024 * 1024, 2 * vmem_est)))

    inv_tau = 1.0 / float(temperature)

    in_specs = [
        pl.BlockSpec((tile, d), lambda i, j: (i, 0)),   # row operand
        pl.BlockSpec((tile, d), lambda i, j: (j, 0)),   # column operand
    ]
    scratch = [
        pltpu.VMEM((tile, d), mm_dtype),    # cached scaled row operand
        pltpu.VMEM((tile, 1), jnp.float32),  # running max
        pltpu.VMEM((tile, 1), jnp.float32),  # running sum
    ]

    if use_partner:
        pshift = batch_size // tile
        in_specs.append(
            pl.BlockSpec((tile, d), lambda i, j: ((i + pshift) % grid, 0)))
        kernel = functools.partial(
            _ntxent_kernel_partner,
            grid_cols=grid, inv_tau=inv_tau, mm_dtype=mm_dtype)
        args = (x, x, x)
    else:
        scratch.append(pltpu.VMEM((tile, 1), jnp.float32))   # positive logit
        kernel = functools.partial(
            _ntxent_kernel_generic,
            tile=tile, batch_size=batch_size, two_n=two_n,
            grid_cols=grid, inv_tau=inv_tau, mm_dtype=mm_dtype)
        args = (x, x)

    per_row = pl.pallas_call(
        kernel,
        out_shape=jax.ShapeDtypeStruct((two_n, 1), jnp.float32),
        grid_spec=pltpu.PrefetchScalarGridSpec(
            num_scalar_prefetch=0,
            grid=(grid, grid),
            in_specs=in_specs,
            out_specs=pl.BlockSpec((tile, 1), lambda i, j: (i, 0)),
            scratch_shapes=scratch,
        ),
        compiler_params=pltpu.CompilerParams(
            dimension_semantics=("parallel", "arbitrary"),
            vmem_limit_bytes=vmem_limit,
        ),
    )(*args)

    return jnp.sum(per_row) / two_n


def _reference_loss(rep, tau, cosine):
    """Pure-JAX reference mirroring the PyTorch module exactly."""
    rep = rep.astype(jnp.float32)
    two_n = rep.shape[0]
    n = two_n // 2
    if cosine:
        norm = jnp.sqrt(jnp.sum(rep * rep, axis=-1, keepdims=True))
        rep = rep / jnp.maximum(norm, 1e-8)
    sim = jnp.matmul(rep, rep.T, precision=lax.Precision.HIGHEST) / tau
    idx = jnp.arange(two_n)
    positives = sim[idx, (idx + n) % two_n]
    masked = jnp.where(idx[:, None] == idx[None, :], -jnp.inf, sim)
    lse = jax.scipy.special.logsumexp(masked, axis=-1)
    return jnp.sum(lse - positives) / two_n


if __name__ == "__main__":
    tau = 0.1
    key = jax.random.PRNGKey(0)
    k1, k2, k3 = jax.random.split(key, 3)

    # Case 1: tiny single-tile problem (batch_size=4, D=32) -> generic kernel.
    rep1 = jax.random.normal(k1, (2 * 4, 32), dtype=jnp.float32)
    out1 = jax.block_until_ready(joint_loss(rep1, temperature=tau))
    ref1 = _reference_loss(rep1, tau, cosine=False)
    assert jnp.allclose(out1, ref1, rtol=1e-4, atol=1e-4), (out1, ref1)

    # Case 2: partner-aligned multi-block grid (batch=16, tile=8 -> 4x4 grid):
    # exercises the partner-block positive path, the lax.cond diagonal mask
    # and the online LSE across multiple column steps.
    rep2 = jax.random.normal(k2, (2 * 16, 64), dtype=jnp.float32)
    out2 = jax.block_until_ready(joint_loss(rep2, temperature=tau, block_rows=8))
    ref2 = _reference_loss(rep2, tau, cosine=False)
    assert jnp.allclose(out2, ref2, rtol=1e-4, atol=1e-4), (out2, ref2)

    # Case 3: unaligned partner (batch=24, tile=16, grid=3): generic fallback
    # with the positives split across two column blocks.
    rep3 = jax.random.normal(k3, (2 * 24, 32), dtype=jnp.float32)
    out3 = jax.block_until_ready(joint_loss(rep3, temperature=tau, block_rows=16))
    ref3 = _reference_loss(rep3, tau, cosine=False)
    assert jnp.allclose(out3, ref3, rtol=1e-4, atol=1e-4), (out3, ref3)

    # Case 4: cosine-similarity path (normalization hoisted to the wrapper).
    out4 = jax.block_until_ready(
        joint_loss(rep2, temperature=tau, cosine_similarity=True, block_rows=8))
    ref4 = _reference_loss(rep2, tau, cosine=True)
    assert jnp.allclose(out4, ref4, rtol=1e-3, atol=1e-3), (out4, ref4)

    print("KERNEL_OK")
</pallas_src>

<mosaic_0001>
module attributes {stable_mosaic.version = 11 : i64} {
  func.func @_ntxent_kernel_generic(%arg0: i32, %arg1: i32, %arg2: memref<8x32xf32, #tpu.memory_space<vmem>>, %arg3: memref<8x32xf32, #tpu.memory_space<vmem>>, %arg4: memref<8x1xf32, #tpu.memory_space<vmem>>, %arg5: memref<8x32xf32, #tpu.memory_space<vmem>>, %arg6: memref<8x1xf32, #tpu.memory_space<vmem>>, %arg7: memref<8x1xf32, #tpu.memory_space<vmem>>, %arg8: memref<8x1xf32, #tpu.memory_space<vmem>>) attributes {dimension_semantics = [#tpu.dimension_semantics<parallel>, #tpu.dimension_semantics<arbitrary>], iteration_bounds = array<i64: 1, 1>, scalar_prefetch = 0 : i64, scratch_operands = 4 : i64, tpu.core_type = #tpu.core_type<tc>, window_params = [{transform_indices = @transform_0, window_bounds = array<i64: 8, 32>}, {transform_indices = @transform_1, window_bounds = array<i64: 8, 32>}, {transform_indices = @transform_2, window_bounds = array<i64: 8, 1>}]} {
    %c0_i32 = arith.constant 0 : i32
    %0 = arith.cmpi eq, %arg1, %c0_i32 : i32
    %1 = arith.extui %0 : i1 to i32
    %c0_i32_0 = arith.constant 0 : i32
    %2 = arith.cmpi ne, %1, %c0_i32_0 : i32
    scf.if %2 {
      %c0_26 = arith.constant 0 : index
      %c0_27 = arith.constant 0 : index
      %53 = vector.load %arg2[%c0_26, %c0_27] : memref<8x32xf32, #tpu.memory_space<vmem>>, vector<8x32xf32>
      %cst_28 = arith.constant 1.000000e+01 : f32
      %54 = vector.broadcast %cst_28 : f32 to vector<8x32xf32>
      %55 = arith.mulf %53, %54 : vector<8x32xf32>
      %c0_29 = arith.constant 0 : index
      %c0_30 = arith.constant 0 : index
      %56 = vector.load %arg5[%c0_29, %c0_30] : memref<8x32xf32, #tpu.memory_space<vmem>>, vector<8x32xf32>
      tpu.vector_store %arg5[%c0_29, %c0_30], %55 {strides = array<i32>} : memref<8x32xf32, #tpu.memory_space<vmem>>, vector<8x32xf32>,
      %cst_31 = arith.constant -1.000000e+30 : f32
      %57 = vector.broadcast %cst_31 : f32 to vector<8x1xf32>
      %c0_32 = arith.constant 0 : index
      %c0_33 = arith.constant 0 : index
      %58 = vector.load %arg6[%c0_32, %c0_33] : memref<8x1xf32, #tpu.memory_space<vmem>>, vector<8x1xf32>
      tpu.vector_store %arg6[%c0_32, %c0_33], %57 {strides = array<i32>} : memref<8x1xf32, #tpu.memory_space<vmem>>, vector<8x1xf32>,
      %cst_34 = arith.constant 0.000000e+00 : f32
      %59 = vector.broadcast %cst_34 : f32 to vector<8x1xf32>
      %c0_35 = arith.constant 0 : index
      %c0_36 = arith.constant 0 : index
      %60 = vector.load %arg7[%c0_35, %c0_36] : memref<8x1xf32, #tpu.memory_space<vmem>>, vector<8x1xf32>
      tpu.vector_store %arg7[%c0_35, %c0_36], %59 {strides = array<i32>} : memref<8x1xf32, #tpu.memory_space<vmem>>, vector<8x1xf32>,
      %cst_37 = arith.constant 0.000000e+00 : f32
      %61 = vector.broadcast %cst_37 : f32 to vector<8x1xf32>
      %c0_38 = arith.constant 0 : index
      %c0_39 = arith.constant 0 : index
      %62 = vector.load %arg8[%c0_38, %c0_39] : memref<8x1xf32, #tpu.memory_space<vmem>>, vector<8x1xf32>
      tpu.vector_store %arg8[%c0_38, %c0_39], %61 {strides = array<i32>} : memref<8x1xf32, #tpu.memory_space<vmem>>, vector<8x1xf32>,
    } else {
    }
    %c0 = arith.constant 0 : index
    %c0_1 = arith.constant 0 : index
    %3 = vector.load %arg5[%c0, %c0_1] : memref<8x32xf32, #tpu.memory_space<vmem>>, vector<8x32xf32>
    %c0_2 = arith.constant 0 : index
    %c0_3 = arith.constant 0 : index
    %4 = vector.load %arg3[%c0_2, %c0_3] : memref<8x32xf32, #tpu.memory_space<vmem>>, vector<8x32xf32>
    %cst = arith.constant dense<0.000000e+00> : vector<8x8xf32>
    %5 = tpu.matmul %3, %4, %cst {dimension_numbers = #tpu.dot_dimension_numbers<[1], [1], [0], [0], [0, 0, 1, 0], [], []>} : vector<8x32xf32>, vector<8x32xf32>, vector<8x8xf32> -> vector<8x8xf32>
    %6 = tpu.iota {dimensions = array<i32: 0>} : vector<8x8xi32>
    %7 = tpu.iota {dimensions = array<i32: 1>} : vector<8x8xi32>
    %8 = arith.cmpi eq, %6, %7 : vector<8x8xi32>
    %cst_4 = arith.constant -1.000000e+30 : f32
    %9 = vector.broadcast %cst_4 : f32 to vector<8x8xf32>
    %10 = arith.select %8, %9, %5 : vector<8x8xi1>, vector<8x8xf32>
    %11 = tpu.iota {dimensions = array<i32: 0>} : vector<8x8xi32>
    %12 = tpu.iota {dimensions = array<i32: 1>} : vector<8x8xi32>
    %c8_i32 = arith.constant 8 : i32
    %13 = arith.muli %arg0, %c8_i32 : i32
    %14 = vector.broadcast %13 : i32 to vector<8x8xi32>
    %15 = arith.addi %14, %11 : vector<8x8xi32>
    %c8_i32_5 = arith.constant 8 : i32
    %16 = arith.muli %arg1, %c8_i32_5 : i32
    %17 = vector.broadcast %16 : i32 to vector<8x8xi32>
    %18 = arith.addi %17, %12 : vector<8x8xi32>
    %c4_i32 = arith.constant 4 : i32
    %19 = vector.broadcast %c4_i32 : i32 to vector<8x8xi32>
    %20 = arith.cmpi slt, %15, %19 : vector<8x8xi32>
    %c4_i32_6 = arith.constant 4 : i32
    %21 = vector.broadcast %c4_i32_6 : i32 to vector<8x8xi32>
    %22 = arith.addi %15, %21 : vector<8x8xi32>
    %c4_i32_7 = arith.constant 4 : i32
    %23 = vector.broadcast %c4_i32_7 : i32 to vector<8x8xi32>
    %24 = arith.subi %15, %23 : vector<8x8xi32>
    %25 = arith.select %20, %22, %24 : vector<8x8xi1>, vector<8x8xi32>
    %c0_8 = arith.constant 0 : index
    %c0_9 = arith.constant 0 : index
    %26 = vector.load %arg8[%c0_8, %c0_9] : memref<8x1xf32, #tpu.memory_space<vmem>>, vector<8x1xf32>
    %27 = arith.cmpi eq, %18, %25 : vector<8x8xi32>
    %cst_10 = arith.constant 0.000000e+00 : f32
    %28 = vector.broadcast %cst_10 : f32 to vector<8x8xf32>
    %29 = arith.select %27, %10, %28 : vector<8x8xi1>, vector<8x8xf32>
    %cst_11 = arith.constant dense<0.000000e+00> : vector<8xf32>
    %30 = vector.multi_reduction <add>, %29, %cst_11 [1] : vector<8x8xf32> to vector<8xf32>
    %31 = vector.shape_cast %30 : vector<8xf32> to vector<8x1xf32>
    %32 = arith.addf %26, %31 : vector<8x1xf32>
    %c0_12 = arith.constant 0 : index
    %c0_13 = arith.constant 0 : index
    %33 = vector.load %arg8[%c0_12, %c0_13] : memref<8x1xf32, #tpu.memory_space<vmem>>, vector<8x1xf32>
    tpu.vector_store %arg8[%c0_12, %c0_13], %32 {strides = array<i32>} : memref<8x1xf32, #tpu.memory_space<vmem>>, vector<8x1xf32>,
    %c0_14 = arith.constant 0 : index
    %c0_15 = arith.constant 0 : index
    %34 = vector.load %arg6[%c0_14, %c0_15] : memref<8x1xf32, #tpu.memory_space<vmem>>, vector<8x1xf32>
    %cst_16 = arith.constant dense<0xFF800000> : vector<8xf32>
    %35 = vector.multi_reduction <maximumf>, %10, %cst_16 [1] : vector<8x8xf32> to vector<8xf32>
    %36 = vector.shape_cast %35 : vector<8xf32> to vector<8x1xf32>
    %37 = arith.maximumf %34, %36 : vector<8x1xf32>
    %38 = arith.subf %34, %37 : vector<8x1xf32>
    %39 = math.exp %38 : vector<8x1xf32>
    %c0_17 = arith.constant 0 : index
    %c0_18 = arith.constant 0 : index
    %40 = vector.load %arg7[%c0_17, %c0_18] : memref<8x1xf32, #tpu.memory_space<vmem>>, vector<8x1xf32>
    %41 = arith.mulf %39, %40 : vector<8x1xf32>
    %42 = vector.broadcast %37 : vector<8x1xf32> to vector<8x8xf32>
    %43 = arith.subf %10, %42 : vector<8x8xf32>
    %44 = math.exp %43 : vector<8x8xf32>
    %cst_19 = arith.constant dense<0.000000e+00> : vector<8xf32>
    %45 = vector.multi_reduction <add>, %44, %cst_19 [1] : vector<8x8xf32> to vector<8xf32>
    %46 = vector.shape_cast %45 : vector<8xf32> to vector<8x1xf32>
    %47 = arith.addf %41, %46 : vector<8x1xf32>
    %c0_20 = arith.constant 0 : index
    %c0_21 = arith.constant 0 : index
    %48 = vector.load %arg7[%c0_20, %c0_21] : memref<8x1xf32, #tpu.memory_space<vmem>>, vector<8x1xf32>
    tpu.vector_store %arg7[%c0_20, %c0_21], %47 {strides = array<i32>} : memref<8x1xf32, #tpu.memory_space<vmem>>, vector<8x1xf32>,
    %c0_22 = arith.constant 0 : index
    %c0_23 = arith.constant 0 : index
    %49 = vector.load %arg6[%c0_22, %c0_23] : memref<8x1xf32, #tpu.memory_space<vmem>>, vector<8x1xf32>
    tpu.vector_store %arg6[%c0_22, %c0_23], %37 {strides = array<i32>} : memref<8x1xf32, #tpu.memory_space<vmem>>, vector<8x1xf32>,
    %c0_i32_24 = arith.constant 0 : i32
    %50 = arith.cmpi eq, %arg1, %c0_i32_24 : i32
    %51 = arith.extui %50 : i1 to i32
    %c0_i32_25 = arith.constant 0 : i32
    %52 = arith.cmpi ne, %51, %c0_i32_25 : i32
    scf.if %52 {
      %c0_26 = arith.constant 0 : index
      %c0_27 = arith.constant 0 : index
      %53 = vector.load %arg6[%c0_26, %c0_27] : memref<8x1xf32, #tpu.memory_space<vmem>>, vector<8x1xf32>
      %c0_28 = arith.constant 0 : index
      %c0_29 = arith.constant 0 : index
      %54 = vector.load %arg7[%c0_28, %c0_29] : memref<8x1xf32, #tpu.memory_space<vmem>>, vector<8x1xf32>
      %55 = math.log %54 : vector<8x1xf32>
      %56 = arith.addf %53, %55 : vector<8x1xf32>
      %c0_30 = arith.constant 0 : index
      %c0_31 = arith.constant 0 : index
      %57 = vector.load %arg8[%c0_30, %c0_31] : memref<8x1xf32, #tpu.memory_space<vmem>>, vector<8x1xf32>
      %58 = arith.subf %56, %57 : vector<8x1xf32>
      %c0_32 = arith.constant 0 : index
      %c0_33 = arith.constant 0 : index
      %59 = vector.load %arg4[%c0_32, %c0_33] : memref<8x1xf32, #tpu.memory_space<vmem>>, vector<8x1xf32>
      tpu.vector_store %arg4[%c0_32, %c0_33], %58 {strides = array<i32>} : memref<8x1xf32, #tpu.memory_space<vmem>>, vector<8x1xf32>,
    } else {
    }
    return
  }
  func.func @transform_0(%arg0: i32, %arg1: i32) -> (i32, i32) {
    %c0_i32 = arith.constant 0 : i32
    %c0_i32_0 = arith.constant 0 : i32
    return %arg0, %c0_i32 : i32, i32
  }
  func.func @transform_1(%arg0: i32, %arg1: i32) -> (i32, i32) {
    %c0_i32 = arith.constant 0 : i32
    %c0_i32_0 = arith.constant 0 : i32
    return %arg1, %c0_i32 : i32, i32
  }
  func.func @transform_2(%arg0: i32, %arg1: i32) -> (i32, i32) {
    %c0_i32 = arith.constant 0 : i32
    %c0_i32_0 = arith.constant 0 : i32
    return %arg0, %c0_i32 : i32, i32
  }
}

</mosaic_0001>

<bundles_post_ra>
// kernel: tpu_custom_call.1
= control target key start
LH: loop header
LB: loop body
LE: loop exit
PB: predicated region body
PF: predicated region fallthrough
CT: control target
= control target key end

     0   :  { %7 = vsyncpa [#allocation7], 0  ;;  %s301_s0 = inlined_call_operand.hbm [shape: f32[8,32], index: 0, kind: input, shape index: {}]   ;;  %s302_s1 = inlined_call_operand.hbm [shape: f32[8,32], index: 1, kind: input, shape index: {}]   ;;  %s303_s2 = inlined_call_operand.vmem [shape: f32[8,1], index: 2, kind: output, shape index: {}]  }
   0x1   :  { %8 = vsyncpa [#allocation9], 0  ;;  %s260_s9 = smov [#allocation6]   ;;  %s261_s11 = smov [#allocation8]  }
   0x2   :  { %s15_s10 = sshll.u32 %s260_s9, 4  ;;  %s25_s12 = sshll.u32 %s261_s11, 4  ;;  %s16_s10 = int_to_ptr.vmem [resolvable:$true] %s15_s10  ;;  %s26_s12 = int_to_ptr.vmem [resolvable:$true] %s25_s12 }
   0x3   :  { %s224_s13 = scalar_lea.vmem %s16_s10, 128  ;;  %p229_p1 = scmp.lt.s32.totalorder %s16_s10, %s16_s10 }
   0x4   :  { %p225_p0 = scmp.ne.s32.totalorder %s16_s10, %s224_s13  ;;  %p230_p2 = scmp.lt.s32.totalorder %s224_s13, %s224_s13 }
   0x6   :  { %p231_p3 = por %p230_p2, %p229_p1 }
   0x8   :  { %p232_p4 = pnand %p231_p3, %p225_p0 }
   0xa   :  { %235 = shalt.err (!%p232_p4)
}
   0xb   :  { %18 = dma.hbm_to_vmem [thread:$0]  %s301_s0, 128, %s16_s10, [#allocation7]  }
   0xc   :  { %s244_s16 = scalar_lea.vmem %s26_s12, 128  ;;  %p249_p6 = scmp.lt.s32.totalorder %s26_s12, %s26_s12 }
   0xd   :  { %p245_p5 = scmp.ne.s32.totalorder %s26_s12, %s244_s16  ;;  %p250_p7 = scmp.lt.s32.totalorder %s244_s16, %s244_s16 }
   0xf   :  { %p251_p8 = por %p250_p7, %p249_p6 }
  0x11   :  { %p252_p9 = pnand %p251_p8, %p245_p5 }
  0x13   :  { %255 = shalt.err (!%p252_p9)
}
  0x14   :  { %28 = dma.hbm_to_vmem [thread:$0]  %s302_s1, 128, %s26_s12, [#allocation9]  }
  0x15   :  { %256 = dma.done.wait [#allocation7], 128  }
  0x16   :  { %257 = vsyncadd [#allocation7], 4294967168 }
  0x17   :  { %258 = dma.done.wait [#allocation9], 128  }
  0x18   :  { %259 = vsyncadd [#allocation9], 4294967168  ;;  %vm43_vm0 = vcmask 7168   ;;  %v262_v0 = vmov 0.0   ;;  %vm263_vm1 = vmmov 0   ;;  %v39_v1 = vld [vmem:[#allocation6] sm:$0xff]  ;;  %v126_v5 = vlaneseq }
  0x19   :  { %45 = vst.msk [vmem:[#allocation4] sm:$0xff] %vm43_vm0, %v262_v0  ;;  %46 = vst.msk [vmem:[#allocation5] sm:$0xff] %vm43_vm0, %v262_v0  ;;  %198 = vmatprep.subr.mxu0 %v262_v0  ;;  %200 = vmatprep.mubr.msk.f32.mxu0 %vm263_vm1, %v262_v0  ;;  %vm41_vm2 = vcmask 261120   ;;  %v48_v2 = vld [vmem:[#allocation8] sm:$0xff]  ;;  %v40_v3 = vmul.f32 10.0, %v39_v1  ;;  %vm145_vm6 = vcmask 64512  }
  0x1a   :  { %199 = vmatpush3.xpose.msk.msra.mxu0 %vm41_vm2, %v48_v2  ;;  %v127_v6 = vshrl.u32 %v126_v5, 7  ;;  %v129_v7 = vand.u32 127, %v126_v5  ;;  %v264_v11 = vmov -1e+30   ;;  %v265_v16 = vmov 0  }
  0x1b   :  { %42 = vst.msk [vmem:[#allocation2] sm:$0xff] %vm41_vm2, %v40_v3  ;;  %209 = vset.pattern.permute.xlu0 %v265_v16 }
  0x1c   :  { %v139_v8 = vadd.s32 4, %v127_v6  ;;  %v195_v9 = vadd.s32 4294967292, %v127_v6  ;;  %vm138_vm3 = vcmp.lt.s32.totalorder %v127_v6, 4  ;;  %44 = vst.msk [vmem:[#allocation3] sm:$0xff] %vm43_vm0, %v264_v11  ;;  %vm130_vm5 = vcmp.eq.s32.totalorder %v127_v6, %v129_v7 }
  0x1e   :  { %v141_v10 = vsel %vm138_vm3, %v139_v8, %v195_v9 }
  0x1f   :  { %vm143_vm4 = vcmp.eq.s32.totalorder %v129_v7, %v141_v10 }
  0x20   :  { %v160_v30 = vld [vmem:[#allocation4] sm:$0xff]  ;;  %v142_v34 = vld [vmem:[#allocation5] sm:$0xff] }
  0x22   :  { %v47_v4 = vld [vmem:[#allocation2] sm:$0xff] }
  0x23   :  { %201 = vmatmul.mubr.msk.f32.vlgmr.msra.gmra.mxu0 %vm41_vm2, %v47_v4  ;;  %v152_v17 = vld [vmem:[#allocation3] sm:$0xff] }
  0xe3   :  { %v122_v12 = vpop.f32.mrf.mxu0 }
  0xe4   :  { %v131_v13 = vsel %vm130_vm5, -1e+30, %v122_v12 }
  0xe5   :  { %v202_v14 = vpop.f32.mrf.mxu0  ;;  %v153_v15 = vsel %vm145_vm6, %v131_v13, -inf  ;;  %v144_v26 = vsel %vm143_vm4, %v131_v13, 0.0 }
  0xe6   :  { %154 = vmax.xlane.f32.xlu0 %v153_v15  ;;  %v146_v27 = vsel %vm145_vm6, %v144_v26, 0.0 }
 0x16f   :  { %v155_v18 = vpop.xlane.xlu0 %154 }
 0x170   :  { %v156_v19 = vmax.f32 %v152_v17, %v155_v18 }
 0x172   :  { %v157_v20 = vsub.f32 %v152_v17, %v156_v19  ;;  %175 = vst.msk [vmem:[#allocation3] sm:$0xff] %vm43_vm0, %v156_v19  ;;  %164 = vperm.xlu0 %209, %v156_v19  }
 0x174   :  { %v158_v28 = vmul.f32 1.442695, %v157_v20 }
 0x179   :  { %v179_v40 = vld [vmem:[#allocation3] sm:$0xff] }
 0x1ed   :  { %v165_v21 = vpop.permute.xlu0 %164 }
 0x1ee   :  { %v167_v22 = vsub.f32 %v131_v13, %v165_v21 }
 0x1f0   :  { %v168_v23 = vmul.f32 1.442695, %v167_v22 }
 0x1f2   :  { %210 = vpow2.f32 %v168_v23 }
 0x1f3   :  { %212 = vpow2.f32 %v158_v28 }
 0x1ff   :  { %v211_v24 = vpop.eup %210 }
 0x200   :  { %v170_v25 = vsel %vm145_vm6, %v211_v24, 0.0  ;;  %v213_v29 = vpop.eup %212 }
 0x201   :  { %171 = vadd.xlane.f32.xlu1 %v170_v25  ;;  %v161_v31 = vmul.f32 %v213_v29, %v160_v30 }
 0x205   :  { %147 = vadd.xlane.f32.xlu1 %v146_v27 }
 0x28a   :  { %v172_v32 = vpop.xlane.xlu1 %171 }
 0x28b   :  { %v173_v33 = vadd.f32 %v172_v32, %v161_v31 }
 0x28d   :  { %174 = vst.msk [vmem:[#allocation4] sm:$0xff] %vm43_vm0, %v173_v33 }
 0x28e   :  { %v148_v35 = vpop.xlane.xlu1 %147 }
 0x28f   :  { %v149_v36 = vadd.f32 %v148_v35, %v142_v34 }
 0x291   :  { %151 = vst.msk [vmem:[#allocation5] sm:$0xff] %vm43_vm0, %v149_v36 }
 0x294   :  { %v180_v37 = vld [vmem:[#allocation4] sm:$0xff] }
 0x295   :  { %214 = vlog2.f32 %v180_v37 }
 0x298   :  { %v184_v42 = vld [vmem:[#allocation5] sm:$0xff] }
 0x2a2   :  { %v215_v38 = vpop.eup %214 }
 0x2a3   :  { %v182_v39 = vmul.f32 0.6931472, %v215_v38 }
 0x2a5   :  { %v183_v41 = vadd.f32 %v182_v39, %v179_v40 }
 0x2a7   :  { %v185_v43 = vsub.f32 %v183_v41, %v184_v42 }
 0x2a9   :  { %186 = vst.msk [vmem:[%s303_s2] sm:$0xff] %vm43_vm0, %v185_v43 }
 0x2aa   :  { %191 = vsyncpa [#allocation7], 1 }
 0x2ab   :  { %192 = vsyncpa [#allocation9], 1 }

</bundles_post_ra>
